<compile_context>
chip_gen: v7x
topology: tpu7x:2x2x1
jax: 0.10.0
libtpu: 0.0.40
codegen_flags: <defaults>
</compile_context>

<pallas_src>
import functools

import jax
import jax.numpy as jnp
from jax import lax
from jax.experimental import pallas as pl
from jax.experimental.pallas import tpu as pltpu

HIDDEN = 200          # logical hidden width (PyTorch)
H_PAD = 256           # lane-padded hidden width
LANE = 128
BN_EPS = 1e-5

# Fused-path budget: estimated live bytes must stay below this; the scoped VMEM limit is
# kept under v7x's 64 MiB physical VMEM (v5e/v6e have 128 MiB, so they are fine too).
_FUSED_BUDGET = 28 * 1024 * 1024
_VMEM_LIMIT = 44 * 1024 * 1024


def _round_up(n, m):
    return ((n + m - 1) // m) * m


def _bn_full(h, gamma, beta):
    """Training-mode BatchNorm1d over the full batch (biased variance), f32."""
    mu = jnp.mean(h, axis=0, keepdims=True)
    d = h - mu
    var = jnp.mean(d * d, axis=0, keepdims=True)
    return d * lax.rsqrt(var + BN_EPS) * gamma + beta


# ---------------------------------------------------------------------------
# Path A: whole batch resident in VMEM -> one fused kernel (no HBM round trips)
# ---------------------------------------------------------------------------
def _fc_fused(x, w1, w2, w4, vecs, n_pad):
    batch = x.shape[0]

    def kernel(x_ref, w1_ref, w2_ref, w4_ref, vec_ref, o_ref):
        v = vec_ref[...]
        b1, g1, be1 = v[0:1, :H_PAD], v[1:2, :H_PAD], v[2:3, :H_PAD]
        b2, g2, be2 = v[3:4, :H_PAD], v[4:5, :H_PAD], v[5:6, :H_PAD]
        b4 = v[6:7, :n_pad]

        xb = x_ref[...].astype(jnp.bfloat16)              # cast in-kernel (no HBM copy)
        h = jnp.dot(xb, w1_ref[...], preferred_element_type=jnp.float32) + b1
        h = _bn_full(h, g1, be1)
        h = jnp.dot(h.astype(jnp.bfloat16), w2_ref[...],
                    preferred_element_type=jnp.float32) + b2
        h = jnp.maximum(h, 0.0)
        h = _bn_full(h, g2, be2)
        out = jnp.dot(h.astype(jnp.bfloat16), w4_ref[...],
                      preferred_element_type=jnp.float32) + b4
        o_ref[...] = out.astype(o_ref.dtype)

    vmem = pl.BlockSpec(memory_space=pltpu.MemorySpace.VMEM)
    return pl.pallas_call(
        kernel,
        out_shape=jax.ShapeDtypeStruct((batch, n_pad), jnp.float32),
        in_specs=[vmem] * 5,
        out_specs=vmem,
        compiler_params=pltpu.CompilerParams(vmem_limit_bytes=_VMEM_LIMIT),
    )(x, w1, w2, w4, vecs)


# ---------------------------------------------------------------------------
# Path B: huge batches -> batch-tiled 3-stage pipeline, bf16 intermediates,
#         per-tile partial BN statistics reduced in the wrapper (all stages parallel)
# ---------------------------------------------------------------------------
def _pick_tile(batch, row_bytes):
    for tb in (2048, 1024, 512, 256):
        if batch >= 2 * tb and tb * row_bytes <= 8 * 1024 * 1024:
            return tb
    return 256


def _fc_tiled(x, w1, w2, w4, vecs, n_pad, vw):
    batch, k = x.shape
    row_bytes = 4 * k + 12 * H_PAD
    tb = _pick_tile(batch, row_bytes)
    nb = _round_up(batch, tb) // tb
    inv_n = 1.0 / float(batch)
    cparams = pltpu.CompilerParams(dimension_semantics=("parallel",),
                                   vmem_limit_bytes=_VMEM_LIMIT)

    def _partial_stats(st_ref, h, tile_idx):
        """Write per-tile sum / sum-of-squares (rows >= batch masked out)."""
        if batch % tb == 0:
            hm, hm2 = h, h * h
        else:
            rows = lax.broadcasted_iota(jnp.int32, (tb, 1), 0) + tile_idx * tb
            valid = rows < batch
            hm = jnp.where(valid, h, 0.0)
            hm2 = jnp.where(valid, h * h, 0.0)
        st_ref[0:1, :] = jnp.sum(hm, axis=0, keepdims=True)
        st_ref[1:2, :] = jnp.sum(hm2, axis=0, keepdims=True)

    def _scale_shift(partials, gamma, beta):
        p = partials.reshape(nb, 8, H_PAD)
        s = jnp.sum(p[:, 0, :], axis=0)
        ss = jnp.sum(p[:, 1, :], axis=0)
        mu = s * inv_n
        var = jnp.maximum(ss * inv_n - mu * mu, 0.0)
        scale = lax.rsqrt(var + BN_EPS) * gamma
        shift = beta - mu * scale
        return scale, shift

    # ---- stage 1: h1 = fc1(x) (bf16 out) + per-tile bn1 stats ---------------
    def stage1(x_ref, w1_ref, vec_ref, h1_ref, st_ref):
        i = pl.program_id(0)
        b1 = vec_ref[0:1, :H_PAD]
        h = jnp.dot(x_ref[...].astype(jnp.bfloat16), w1_ref[...],
                    preferred_element_type=jnp.float32) + b1
        h1_ref[...] = h.astype(h1_ref.dtype)
        _partial_stats(st_ref, h, i)

    h1, st1 = pl.pallas_call(
        stage1,
        grid=(nb,),
        out_shape=(jax.ShapeDtypeStruct((nb * tb, H_PAD), jnp.bfloat16),
                   jax.ShapeDtypeStruct((nb * 8, H_PAD), jnp.float32)),
        in_specs=[pl.BlockSpec((tb, k), lambda i: (i, 0)),
                  pl.BlockSpec((k, H_PAD), lambda i: (0, 0)),
                  pl.BlockSpec((8, vw), lambda i: (0, 0))],
        out_specs=(pl.BlockSpec((tb, H_PAD), lambda i: (i, 0)),
                   pl.BlockSpec((8, H_PAD), lambda i: (i, 0))),
        compiler_params=cparams,
    )(x, w1, vecs)

    # wrapper-side reduction of the tiny partial stats + BN folding (a few KB of work)
    scale1, shift1 = _scale_shift(st1, vecs[1, :H_PAD], vecs[2, :H_PAD])
    vec2 = jnp.zeros((8, H_PAD), jnp.float32)
    vec2 = vec2.at[0].set(scale1).at[1].set(shift1).at[2].set(vecs[3, :H_PAD])

    # ---- stage 2: bn1 -> relu(fc2) (bf16 out) + per-tile bn2 stats ----------
    def stage2(h1_ref, w2_ref, vec_ref, h2_ref, st_ref):
        i = pl.program_id(0)
        v = vec_ref[...]
        sc1, sh1, b2 = v[0:1, :], v[1:2, :], v[2:3, :]
        a = h1_ref[...].astype(jnp.float32) * sc1 + sh1
        h = jnp.dot(a.astype(jnp.bfloat16), w2_ref[...],
                    preferred_element_type=jnp.float32) + b2
        h = jnp.maximum(h, 0.0)
        h2_ref[...] = h.astype(h2_ref.dtype)
        _partial_stats(st_ref, h, i)

    h2, st2 = pl.pallas_call(
        stage2,
        grid=(nb,),
        out_shape=(jax.ShapeDtypeStruct((nb * tb, H_PAD), jnp.bfloat16),
                   jax.ShapeDtypeStruct((nb * 8, H_PAD), jnp.float32)),
        in_specs=[pl.BlockSpec((tb, H_PAD), lambda i: (i, 0)),
                  pl.BlockSpec((H_PAD, H_PAD), lambda i: (0, 0)),
                  pl.BlockSpec((8, H_PAD), lambda i: (0, 0))],
        out_specs=(pl.BlockSpec((tb, H_PAD), lambda i: (i, 0)),
                   pl.BlockSpec((8, H_PAD), lambda i: (i, 0))),
        compiler_params=cparams,
    )(h1, w2, vec2)

    scale2, shift2 = _scale_shift(st2, vecs[4, :H_PAD], vecs[5, :H_PAD])
    vec3 = jnp.zeros((8, vw), jnp.float32)
    vec3 = vec3.at[0, :H_PAD].set(scale2).at[1, :H_PAD].set(shift2)
    vec3 = vec3.at[2, :n_pad].set(vecs[6, :n_pad])

    # ---- stage 3: bn2 -> fc4 -------------------------------------------------
    def stage3(h2_ref, w4_ref, vec_ref, o_ref):
        v = vec_ref[...]
        sc2, sh2, b4 = v[0:1, :H_PAD], v[1:2, :H_PAD], v[2:3, :n_pad]
        a = h2_ref[...].astype(jnp.float32) * sc2 + sh2
        out = jnp.dot(a.astype(jnp.bfloat16), w4_ref[...],
                      preferred_element_type=jnp.float32) + b4
        o_ref[...] = out.astype(o_ref.dtype)

    return pl.pallas_call(
        stage3,
        grid=(nb,),
        out_shape=jax.ShapeDtypeStruct((batch, n_pad), jnp.float32),
        in_specs=[pl.BlockSpec((tb, H_PAD), lambda i: (i, 0)),
                  pl.BlockSpec((H_PAD, n_pad), lambda i: (0, 0)),
                  pl.BlockSpec((8, vw), lambda i: (0, 0))],
        out_specs=pl.BlockSpec((tb, n_pad), lambda i: (i, 0)),
        compiler_params=cparams,
    )(h2, w4, vec3)


# ---------------------------------------------------------------------------
# Public forward
# ---------------------------------------------------------------------------
@functools.partial(jax.jit, static_argnames=("force_tiled",))
def fc_forward(x, params, force_tiled=False):
    """x: (batch, input_num) f32; params: dict from init_params. -> (batch, output_num) f32."""
    batch, k = x.shape
    out_num = params["w4"].shape[1]
    n_pad = _round_up(max(out_num, LANE), LANE)
    vw = max(H_PAD, n_pad)

    # Weights: pad hidden/output dims to lane-dense widths, cast to bf16 (tiny, one-time).
    # x itself is NOT padded or cast in the wrapper.
    w1 = jnp.pad(params["w1"], ((0, 0), (0, H_PAD - HIDDEN))).astype(jnp.bfloat16)
    w2 = jnp.pad(params["w2"], ((0, H_PAD - HIDDEN), (0, H_PAD - HIDDEN))).astype(jnp.bfloat16)
    w4 = jnp.pad(params["w4"], ((0, H_PAD - HIDDEN), (0, n_pad - out_num))).astype(jnp.bfloat16)

    def pv(v):  # pad a per-feature vector to the stacked width
        return jnp.pad(v, (0, vw - v.shape[0]))

    vecs = jnp.stack([pv(params["b1"]), pv(params["g1"]), pv(params["be1"]),
                      pv(params["b2"]), pv(params["g2"]), pv(params["be2"]),
                      pv(params["b4"]), jnp.zeros((vw,), jnp.float32)]).astype(jnp.float32)

    # VMEM-budget dispatch: estimated live bytes of the fused kernel (x + a few
    # hidden-width f32 temporaries + padded output + bf16 weights).
    fused_bytes = batch * (4 * k + 12 * H_PAD + 4 * n_pad) \
        + 2 * (w1.size + w2.size + w4.size)
    use_tiled = (force_tiled or fused_bytes > _FUSED_BUDGET) and batch >= 512

    if use_tiled:
        out_p = _fc_tiled(x, w1, w2, w4, vecs, n_pad, vw)
    else:
        out_p = _fc_fused(x, w1, w2, w4, vecs, n_pad)
    return out_p[:, :out_num]


def init_params(key, input_num, output_num):
    """Synthetic parameters matching FC.__init__ shapes (weights stored (in, out))."""
    ks = jax.random.split(key, 6)

    def lin(kw, kb, fan_in, fan_out):
        bound = 1.0 / (fan_in ** 0.5)   # PyTorch default U(-1/sqrt(fan_in), 1/sqrt(fan_in))
        w = jax.random.uniform(kw, (fan_in, fan_out), jnp.float32, -bound, bound)
        b = jax.random.uniform(kb, (fan_out,), jnp.float32, -bound, bound)
        return w, b

    w1, b1 = lin(ks[0], ks[1], input_num, HIDDEN)
    w2, b2 = lin(ks[2], ks[3], HIDDEN, HIDDEN)
    w4, b4 = lin(ks[4], ks[5], HIDDEN, output_num)

    ones = jnp.ones((HIDDEN,), jnp.float32)
    zeros = jnp.zeros((HIDDEN,), jnp.float32)
    return dict(w1=w1, b1=b1, g1=ones, be1=zeros,
                w2=w2, b2=b2, g2=ones, be2=zeros,
                w4=w4, b4=b4)


def fc_reference(x, p):
    """Pure-JAX reference mirroring the kernel's bf16 matmul / f32 accumulation."""
    xb = x.astype(jnp.bfloat16)
    h = jnp.dot(xb, p["w1"].astype(jnp.bfloat16), preferred_element_type=jnp.float32) + p["b1"]
    h = _bn_full(h, p["g1"], p["be1"])
    h = jnp.dot(h.astype(jnp.bfloat16), p["w2"].astype(jnp.bfloat16),
                preferred_element_type=jnp.float32) + p["b2"]
    h = jnp.maximum(h, 0.0)
    h = _bn_full(h, p["g2"], p["be2"])
    return jnp.dot(h.astype(jnp.bfloat16), p["w4"].astype(jnp.bfloat16),
                   preferred_element_type=jnp.float32) + p["b4"]


if __name__ == "__main__":
    key = jax.random.PRNGKey(0)
    k_x, k_x2, k_x3, k_p = jax.random.split(key, 4)

    input_num, output_num = 32, 10
    params = init_params(k_p, input_num, output_num)

    # 1) Small batch -> fused single-VMEM-block path.
    x_small = jax.random.normal(k_x, (8, input_num), jnp.float32)
    out_small = jax.block_until_ready(fc_forward(x_small, params))
    ref_small = fc_reference(x_small, params)
    assert out_small.shape == (8, output_num)
    assert jnp.allclose(out_small, ref_small, atol=2e-3, rtol=2e-3), "small-batch mismatch"

    # 2) Moderate batch -> still the fused path (everything stays in VMEM).
    x_mid = jax.random.normal(k_x2, (1024, input_num), jnp.float32)
    out_mid = jax.block_until_ready(fc_forward(x_mid, params))
    ref_mid = fc_reference(x_mid, params)
    assert out_mid.shape == (1024, output_num)
    assert jnp.allclose(out_mid, ref_mid, atol=2e-3, rtol=2e-3), "fused-batch mismatch"

    # 3) Tiled huge-batch path, forced at a modest non-tile-multiple size to exercise the
    #    remainder masking and the partial-stats reduction.  Looser tolerance because the
    #    tiled path stores h1/h2 in bf16 between stages and uses sum/sum-of-squares stats.
    x_big = jax.random.normal(k_x3, (1000, input_num), jnp.float32)
    out_big = jax.block_until_ready(fc_forward(x_big, params, force_tiled=True))
    ref_big = fc_reference(x_big, params)
    assert out_big.shape == (1000, output_num)
    assert jnp.allclose(out_big, ref_big, atol=2e-2, rtol=2e-2), "tiled-batch mismatch"

    print("KERNEL_OK")
</pallas_src>

<mosaic_0001>
module attributes {stable_mosaic.version = 11 : i64} {
  func.func @kernel(%arg0: memref<8x32xf32, #tpu.memory_space<vmem>>, %arg1: memref<32x256xbf16, #tpu.memory_space<vmem>>, %arg2: memref<256x256xbf16, #tpu.memory_space<vmem>>, %arg3: memref<256x128xbf16, #tpu.memory_space<vmem>>, %arg4: memref<8x256xf32, #tpu.memory_space<vmem>>, %arg5: memref<8x128xf32, #tpu.memory_space<vmem>>) attributes {dimension_semantics = [], scalar_prefetch = 0 : i64, scratch_operands = 0 : i64, tpu.core_type = #tpu.core_type<tc>} {
    %c0 = arith.constant 0 : index
    %c0_0 = arith.constant 0 : index
    %0 = vector.load %arg4[%c0, %c0_0] : memref<8x256xf32, #tpu.memory_space<vmem>>, vector<8x256xf32>
    %1 = vector.extract_strided_slice %0 {offsets = [0, 0], sizes = [1, 256], strides = [1, 1]} : vector<8x256xf32> to vector<1x256xf32>
    %2 = vector.extract_strided_slice %0 {offsets = [1, 0], sizes = [1, 256], strides = [1, 1]} : vector<8x256xf32> to vector<1x256xf32>
    %3 = vector.extract_strided_slice %0 {offsets = [2, 0], sizes = [1, 256], strides = [1, 1]} : vector<8x256xf32> to vector<1x256xf32>
    %4 = vector.extract_strided_slice %0 {offsets = [3, 0], sizes = [1, 256], strides = [1, 1]} : vector<8x256xf32> to vector<1x256xf32>
    %5 = vector.extract_strided_slice %0 {offsets = [4, 0], sizes = [1, 256], strides = [1, 1]} : vector<8x256xf32> to vector<1x256xf32>
    %6 = vector.extract_strided_slice %0 {offsets = [5, 0], sizes = [1, 256], strides = [1, 1]} : vector<8x256xf32> to vector<1x256xf32>
    %7 = vector.extract_strided_slice %0 {offsets = [6, 0], sizes = [1, 128], strides = [1, 1]} : vector<8x256xf32> to vector<1x128xf32>
    %c0_1 = arith.constant 0 : index
    %c0_2 = arith.constant 0 : index
    %8 = vector.load %arg0[%c0_1, %c0_2] : memref<8x32xf32, #tpu.memory_space<vmem>>, vector<8x32xf32>
    %9 = arith.truncf %8 : vector<8x32xf32> to vector<8x32xbf16>
    %c0_3 = arith.constant 0 : index
    %c0_4 = arith.constant 0 : index
    %10 = vector.load %arg1[%c0_3, %c0_4] : memref<32x256xbf16, #tpu.memory_space<vmem>>, vector<32x256xbf16>
    %cst = arith.constant dense<0.000000e+00> : vector<8x256xf32>
    %11 = tpu.matmul %9, %10, %cst {dimension_numbers = #tpu.dot_dimension_numbers<[1], [0], [0], [1], [0, 0, 1, 1], [], []>} : vector<8x32xbf16>, vector<32x256xbf16>, vector<8x256xf32> -> vector<8x256xf32>
    %12 = vector.broadcast %1 : vector<1x256xf32> to vector<8x256xf32>
    %13 = arith.addf %11, %12 : vector<8x256xf32>
    %cst_5 = arith.constant dense<0.000000e+00> : vector<256xf32>
    %14 = vector.multi_reduction <add>, %13, %cst_5 [0] : vector<8x256xf32> to vector<256xf32>
    %15 = vector.shape_cast %14 : vector<256xf32> to vector<1x256xf32>
    %cst_6 = arith.constant 8.000000e+00 : f32
    %16 = vector.broadcast %cst_6 : f32 to vector<1x256xf32>
    %17 = arith.divf %15, %16 : vector<1x256xf32>
    %18 = vector.broadcast %17 : vector<1x256xf32> to vector<8x256xf32>
    %19 = arith.subf %13, %18 : vector<8x256xf32>
    %20 = arith.mulf %19, %19 : vector<8x256xf32>
    %cst_7 = arith.constant dense<0.000000e+00> : vector<256xf32>
    %21 = vector.multi_reduction <add>, %20, %cst_7 [0] : vector<8x256xf32> to vector<256xf32>
    %22 = vector.shape_cast %21 : vector<256xf32> to vector<1x256xf32>
    %cst_8 = arith.constant 8.000000e+00 : f32
    %23 = vector.broadcast %cst_8 : f32 to vector<1x256xf32>
    %24 = arith.divf %22, %23 : vector<1x256xf32>
    %cst_9 = arith.constant 9.99999974E-6 : f32
    %25 = vector.broadcast %cst_9 : f32 to vector<1x256xf32>
    %26 = arith.addf %24, %25 : vector<1x256xf32>
    %27 = math.rsqrt %26 : vector<1x256xf32>
    %28 = vector.broadcast %27 : vector<1x256xf32> to vector<8x256xf32>
    %29 = arith.mulf %19, %28 : vector<8x256xf32>
    %30 = vector.broadcast %2 : vector<1x256xf32> to vector<8x256xf32>
    %31 = arith.mulf %29, %30 : vector<8x256xf32>
    %32 = vector.broadcast %3 : vector<1x256xf32> to vector<8x256xf32>
    %33 = arith.addf %31, %32 : vector<8x256xf32>
    %34 = arith.truncf %33 : vector<8x256xf32> to vector<8x256xbf16>
    %c0_10 = arith.constant 0 : index
    %c0_11 = arith.constant 0 : index
    %35 = vector.load %arg2[%c0_10, %c0_11] : memref<256x256xbf16, #tpu.memory_space<vmem>>, vector<256x256xbf16>
    %cst_12 = arith.constant dense<0.000000e+00> : vector<8x256xf32>
    %36 = tpu.matmul %34, %35, %cst_12 {dimension_numbers = #tpu.dot_dimension_numbers<[1], [0], [0], [1], [0, 0, 1, 1], [], []>} : vector<8x256xbf16>, vector<256x256xbf16>, vector<8x256xf32> -> vector<8x256xf32>
    %37 = vector.broadcast %4 : vector<1x256xf32> to vector<8x256xf32>
    %38 = arith.addf %36, %37 : vector<8x256xf32>
    %cst_13 = arith.constant 0.000000e+00 : f32
    %39 = vector.broadcast %cst_13 : f32 to vector<8x256xf32>
    %40 = arith.maximumf %38, %39 : vector<8x256xf32>
    %cst_14 = arith.constant dense<0.000000e+00> : vector<256xf32>
    %41 = vector.multi_reduction <add>, %40, %cst_14 [0] : vector<8x256xf32> to vector<256xf32>
    %42 = vector.shape_cast %41 : vector<256xf32> to vector<1x256xf32>
    %cst_15 = arith.constant 8.000000e+00 : f32
    %43 = vector.broadcast %cst_15 : f32 to vector<1x256xf32>
    %44 = arith.divf %42, %43 : vector<1x256xf32>
    %45 = vector.broadcast %44 : vector<1x256xf32> to vector<8x256xf32>
    %46 = arith.subf %40, %45 : vector<8x256xf32>
    %47 = arith.mulf %46, %46 : vector<8x256xf32>
    %cst_16 = arith.constant dense<0.000000e+00> : vector<256xf32>
    %48 = vector.multi_reduction <add>, %47, %cst_16 [0] : vector<8x256xf32> to vector<256xf32>
    %49 = vector.shape_cast %48 : vector<256xf32> to vector<1x256xf32>
    %cst_17 = arith.constant 8.000000e+00 : f32
    %50 = vector.broadcast %cst_17 : f32 to vector<1x256xf32>
    %51 = arith.divf %49, %50 : vector<1x256xf32>
    %cst_18 = arith.constant 9.99999974E-6 : f32
    %52 = vector.broadcast %cst_18 : f32 to vector<1x256xf32>
    %53 = arith.addf %51, %52 : vector<1x256xf32>
    %54 = math.rsqrt %53 : vector<1x256xf32>
    %55 = vector.broadcast %54 : vector<1x256xf32> to vector<8x256xf32>
    %56 = arith.mulf %46, %55 : vector<8x256xf32>
    %57 = vector.broadcast %5 : vector<1x256xf32> to vector<8x256xf32>
    %58 = arith.mulf %56, %57 : vector<8x256xf32>
    %59 = vector.broadcast %6 : vector<1x256xf32> to vector<8x256xf32>
    %60 = arith.addf %58, %59 : vector<8x256xf32>
    %61 = arith.truncf %60 : vector<8x256xf32> to vector<8x256xbf16>
    %c0_19 = arith.constant 0 : index
    %c0_20 = arith.constant 0 : index
    %62 = vector.load %arg3[%c0_19, %c0_20] : memref<256x128xbf16, #tpu.memory_space<vmem>>, vector<256x128xbf16>
    %cst_21 = arith.constant dense<0.000000e+00> : vector<8x128xf32>
    %63 = tpu.matmul %61, %62, %cst_21 {dimension_numbers = #tpu.dot_dimension_numbers<[1], [0], [0], [1], [0, 0, 1, 1], [], []>} : vector<8x256xbf16>, vector<256x128xbf16>, vector<8x128xf32> -> vector<8x128xf32>
    %64 = vector.broadcast %7 : vector<1x128xf32> to vector<8x128xf32>
    %65 = arith.addf %63, %64 : vector<8x128xf32>
    %c0_22 = arith.constant 0 : index
    %c0_23 = arith.constant 0 : index
    %66 = vector.load %arg5[%c0_22, %c0_23] : memref<8x128xf32, #tpu.memory_space<vmem>>, vector<8x128xf32>
    tpu.vector_store %arg5[%c0_22, %c0_23], %65 {strides = array<i32>} : memref<8x128xf32, #tpu.memory_space<vmem>>, vector<8x128xf32>,
    return
  }
}

</mosaic_0001>

<bundles_post_ra>
// kernel: fc_forward.1
= control target key start
LH: loop header
LB: loop body
LE: loop exit
PB: predicated region body
PF: predicated region fallthrough
CT: control target
= control target key end

     0   :  { %v833_v2 = vmov 0   ;;  %vm58_vm0 = vcmask 261120   ;;  %s1068_s0 = inlined_call_operand.vmem [shape: f32[8,32], index: 0, kind: input, shape index: {}]   ;;  %s1069_s1 = inlined_call_operand.vmem [shape: bf16[32,256], index: 1, kind: input, shape index: {}]   ;;  %s1070_s2 = inlined_call_operand.vmem [shape: bf16[256,256], index: 2, kind: input, shape index: {}]   ;;  %s1071_s3 = inlined_call_operand.vmem [shape: bf16[256,128], index: 3, kind: input, shape index: {}]   ;;  %s1072_s4 = inlined_call_operand.vmem [shape: f32[8,256], index: 4, kind: input, shape index: {}]   ;;  %s1073_s5 = inlined_call_operand.hbm [shape: f32[8,128], index: 5, kind: output, shape index: {}]  }
   0x1   :  { %v731_v0 = vld [vmem:[%s1069_s1 + $0x4] ss:$8 sps:$4 sm:$0xff]   ;;  %v733_v1 = vld [vmem:[%s1069_s1] ss:$8 sps:$4 sm:$0xff]   ;;  %94 = vmatprep.mubr.bf16.mxu0 %v833_v2  ;;  %v734_v3 = vld [vmem:[%s1069_s1 + $0x14] ss:$8 sps:$4 sm:$0xff]  }
   0x2   :  { %62 = vmatprep.subr.bf16.mxu0 %v731_v0  ;;  %v736_v4 = vld [vmem:[%s1069_s1 + $0x10] ss:$8 sps:$4 sm:$0xff]   ;;  %v24_v5 = vld [vmem:[%s1068_s0] sm:$0xff]  ;;  %v740_v8 = vld [vmem:[%s1070_s2 + $0x14] ss:$8 sps:$4 sm:$0xff]  }
   0x3   :  { %63 = vmatpush1.bf16.msra.mxu0 %v733_v1  ;;  %v737_v6 = vld [vmem:[%s1070_s2 + $0x4] ss:$8 sps:$4 sm:$0xff]   ;;  %v739_v7 = vld [vmem:[%s1070_s2] ss:$8 sps:$4 sm:$0xff]   ;;  %v742_v9 = vld [vmem:[%s1070_s2 + $0x10] ss:$8 sps:$4 sm:$0xff]   ;;  %v25_v10 = vpack.c.bf16 %v24_v5, %v24_v5 }
   0x4   :  { %64 = vmatprep.subr.bf16.mxu0 %v734_v3  ;;  %364 = vmatprep.subr.bf16.mxu1 %v737_v6 }
   0x5   :  { %365 = vmatpush1.bf16.msra.mxu1 %v739_v7 }
   0x6   :  { %366 = vmatprep.subr.bf16.mxu1 %v740_v8 }
   0x7   :  { %65 = vmatpush1.bf16.msra.mxu0 %v736_v4 }
   0x9   :  { %367 = vmatpush1.bf16.msra.mxu1 %v742_v9 }
   0xa   :  { %658 = vmatmul.mubr.msk.bf16.vlgmr.msra.gmra.mrb[0].mxu0 %vm58_vm0, %v25_v10 }
   0xb   :  { %10 = vsyncpa [#allocation3], 0  ;;  %v743_v11 = vld [vmem:[%s1070_s2 + $0x24] ss:$8 sps:$4 sm:$0xff]   ;;  %v745_v12 = vld [vmem:[%s1070_s2 + $0x20] ss:$8 sps:$4 sm:$0xff]   ;;  %v30_v39 = vlaneseq }
   0xc   :  { %368 = vmatprep.subr.bf16.mxu1 %v743_v11  ;;  %v746_v13 = vld [vmem:[%s1070_s2 + $0x34] ss:$8 sps:$4 sm:$0xff]   ;;  %v748_v14 = vld [vmem:[%s1070_s2 + $0x30] ss:$8 sps:$4 sm:$0xff]   ;;  %v749_v15 = vld [vmem:[%s1070_s2 + $0x44] ss:$8 sps:$4 sm:$0xff]  }
   0xd   :  { %369 = vmatpush1.bf16.msra.mxu1 %v745_v12  ;;  %v751_v16 = vld [vmem:[%s1070_s2 + $0x40] ss:$8 sps:$4 sm:$0xff]   ;;  %v752_v17 = vld [vmem:[%s1070_s2 + $0x54] ss:$8 sps:$4 sm:$0xff]   ;;  %v754_v18 = vld [vmem:[%s1070_s2 + $0x50] ss:$8 sps:$4 sm:$0xff]  }
   0xe   :  { %370 = vmatprep.subr.bf16.mxu1 %v746_v13  ;;  %v755_v19 = vld [vmem:[%s1070_s2 + $0x64] ss:$8 sps:$4 sm:$0xff]   ;;  %v757_v20 = vld [vmem:[%s1070_s2 + $0x60] ss:$8 sps:$4 sm:$0xff]   ;;  %v758_v21 = vld [vmem:[%s1070_s2 + $0x74] ss:$8 sps:$4 sm:$0xff]  }
   0xf   :  { %v760_v22 = vld [vmem:[%s1070_s2 + $0x70] ss:$8 sps:$4 sm:$0xff]   ;;  %v761_v23 = vld [vmem:[%s1070_s2 + $0x84] ss:$8 sps:$4 sm:$0xff]   ;;  %v763_v24 = vld [vmem:[%s1070_s2 + $0x80] ss:$8 sps:$4 sm:$0xff]  }
  0x10   :  { %v764_v25 = vld [vmem:[%s1070_s2 + $0x94] ss:$8 sps:$4 sm:$0xff]   ;;  %v766_v26 = vld [vmem:[%s1070_s2 + $0x90] ss:$8 sps:$4 sm:$0xff]   ;;  %v767_v27 = vld [vmem:[%s1070_s2 + $0xa4] ss:$8 sps:$4 sm:$0xff]  }
  0x11   :  { %371 = vmatpush1.bf16.msra.mxu1 %v748_v14  ;;  %v769_v28 = vld [vmem:[%s1070_s2 + $0xa0] ss:$8 sps:$4 sm:$0xff]   ;;  %v770_v29 = vld [vmem:[%s1070_s2 + $0xb4] ss:$8 sps:$4 sm:$0xff]   ;;  %v772_v30 = vld [vmem:[%s1070_s2 + $0xb0] ss:$8 sps:$4 sm:$0xff]  }
  0x12   :  { %372 = vmatprep.subr.bf16.mxu1 %v749_v15  ;;  %v773_v31 = vld [vmem:[%s1070_s2 + $0xc4] ss:$8 sps:$4 sm:$0xff]   ;;  %v775_v32 = vld [vmem:[%s1070_s2 + $0xc0] ss:$8 sps:$4 sm:$0xff]   ;;  %v776_v33 = vld [vmem:[%s1070_s2 + $0xd4] ss:$8 sps:$4 sm:$0xff]  }
  0x13   :  { %v778_v34 = vld [vmem:[%s1070_s2 + $0xd0] ss:$8 sps:$4 sm:$0xff]   ;;  %v779_v35 = vld [vmem:[%s1070_s2 + $0xe4] ss:$8 sps:$4 sm:$0xff]   ;;  %v781_v36 = vld [vmem:[%s1070_s2 + $0xe0] ss:$8 sps:$4 sm:$0xff]  }
  0x14   :  { %v782_v37 = vld [vmem:[%s1070_s2 + $0xf4] ss:$8 sps:$4 sm:$0xff]   ;;  %v784_v38 = vld [vmem:[%s1070_s2 + $0xf0] ss:$8 sps:$4 sm:$0xff]   ;;  %v976_v40 = vshrl.u32 %v30_v39, 7  ;;  %v982_v42 = vld [vmem:[%s1072_s4] sm:$0xff] }
  0x15   :  { %373 = vmatpush1.bf16.msra.mxu1 %v751_v16  ;;  %v987_v43 = vld [vmem:[%s1072_s4 + $0x8] sm:$0xff]  ;;  %v786_v39 = vld [vmem:[%s1071_s3] sm:$0xff]  }
  0x16   :  { %374 = vmatprep.subr.bf16.mxu1 %v752_v17  ;;  %v32_v41 = vsub.s32 0, %v976_v40 }
  0x18   :  { %v33_v44 = vrot.slane %v982_v42, %v32_v41  ;;  %v37_v45 = vrot.slane %v987_v43, %v32_v41  ;;  %v787_v41 = vld [vmem:[%s1071_s3 + $0x48] sm:$0xff]  }
  0x19   :  { %375 = vmatpush1.bf16.msra.mxu1 %v754_v18 }
  0x1a   :  { %376 = vmatprep.subr.bf16.mxu1 %v755_v19 }
  0x1d   :  { %377 = vmatpush1.bf16.msra.mxu1 %v757_v20 }
  0x1e   :  { %378 = vmatprep.subr.bf16.mxu1 %v758_v21 }
  0x21   :  { %379 = vmatpush1.bf16.msra.mxu1 %v760_v22  ;;  %v144_v22 = vsub.s32 1, %v976_v40 }
  0x22   :  { %380 = vmatprep.subr.bf16.mxu1 %v761_v23  ;;  %v154_v23 = vsub.s32 2, %v976_v40 }
  0x25   :  { %381 = vmatpush1.bf16.msra.mxu1 %v763_v24  ;;  %v145_v24 = vrot.slane %v982_v42, %v144_v22 }
  0x26   :  { %382 = vmatprep.subr.bf16.mxu1 %v764_v25 }
  0x29   :  { %383 = vmatpush1.bf16.msra.mxu1 %v766_v26  ;;  %v149_v26 = vrot.slane %v987_v43, %v144_v22 }
  0x2a   :  { %384 = vmatprep.subr.bf16.mxu1 %v767_v27 }
  0x2d   :  { %385 = vmatpush1.bf16.msra.mxu1 %v769_v28 }
  0x2e   :  { %386 = vmatprep.subr.bf16.mxu1 %v770_v29  ;;  %v155_v29 = vrot.slane %v982_v42, %v154_v23 }
  0x31   :  { %387 = vmatpush1.bf16.msra.mxu1 %v772_v30 }
  0x32   :  { %388 = vmatprep.subr.bf16.mxu1 %v773_v31  ;;  %v159_v31 = vrot.slane %v987_v43, %v154_v23 }
  0x35   :  { %389 = vmatpush1.bf16.msra.mxu1 %v775_v32 }
  0x36   :  { %390 = vmatprep.subr.bf16.mxu1 %v776_v33 }
  0x39   :  { %391 = vmatpush1.bf16.msra.mxu1 %v778_v34 }
  0x3a   :  { %392 = vmatprep.subr.bf16.mxu1 %v779_v35 }
  0x3d   :  { %393 = vmatpush1.bf16.msra.mxu1 %v781_v36 }
  0x3e   :  { %394 = vmatprep.subr.bf16.mxu1 %v782_v37 }
  0x41   :  { %395 = vmatpush1.bf16.msra.mxu1 %v784_v38  ;;  %v785_v38 = vld [vmem:[%s1071_s3 + $0x40] sm:$0xff]  }
  0x42   :  { %707 = vmatprep.subr.bf16.mxu0 %v785_v38  ;;  %v447_v38 = vsub.s32 4, %v976_v40 }
  0x43   :  { %708 = vmatpush3.bf16.msra.mxu0 %v786_v39  ;;  %v457_v39 = vsub.s32 5, %v976_v40 }
  0x44   :  { %709 = vmatprep.subr.bf16.mxu0 %v787_v41  ;;  %v448_v41 = vrot.slane %v982_v42, %v447_v38 }
  0xdd   :  { %v96_v46 = vpop.f32.mrb[0].mxu0 }
  0xde   :  { %v97_v47 = vadd.f32 %v96_v46, %v33_v44  ;;  %v98_v48 = vpop.f32.mrb[1].mxu0  ;;  %v788_v44 = vld [vmem:[%s1071_s3 + $0x8] sm:$0xff]   ;;  %v790_v46 = vld [vmem:[%s1071_s3 + $0x10] sm:$0xff]  }
  0xdf   :  { %v99_v49 = vadd.f32 %v98_v48, %v37_v45  ;;  %v100_v50 = vpop.f32.mrb[2].mxu0  ;;  %710 = vmatpush3.bf16.msra.mxu0 %v788_v44  ;;  %v789_v45 = vld [vmem:[%s1071_s3 + $0x50] sm:$0xff]   ;;  %v792_v48 = vld [vmem:[%s1071_s3 + $0x18] sm:$0xff]  }
  0xe0   :  { %v103_v51 = vrot.slane %v97_v47, 4  ;;  %v101_v52 = vpop.f32.mrb[3].mxu0  ;;  %711 = vmatprep.subr.bf16.mxu0 %v789_v45  ;;  %v794_v50 = vld [vmem:[%s1071_s3 + $0x20] sm:$0xff]   ;;  %v452_v45 = vrot.slane %v987_v43, %v447_v38 }
  0xe1   :  { %v109_v53 = vrot.slane %v99_v49, 4  ;;  %v796_v52 = vld [vmem:[%s1071_s3 + $0x28] sm:$0xff]  }
  0xe2   :  { %v104_v54 = vadd.f32 %v103_v51, %v97_v47  ;;  %v795_v51 = vld [vmem:[%s1071_s3 + $0x68] sm:$0xff]  }
  0xe3   :  { %v110_v55 = vadd.f32 %v109_v53, %v99_v49  ;;  %712 = vmatpush3.bf16.msra.mxu0 %v790_v46  ;;  %v797_v53 = vld [vmem:[%s1071_s3 + $0x70] sm:$0xff]  }
  0xe4   :  { %v105_v56 = vrot.slane %v104_v54, 2 }
  0xe5   :  { %v111_v57 = vrot.slane %v110_v55, 2 }
  0xe6   :  { %v106_v58 = vadd.f32 %v105_v56, %v104_v54  ;;  %v798_v54 = vld [vmem:[%s1071_s3 + $0x30] sm:$0xff]   ;;  %v800_v56 = vld [vmem:[%s1071_s3 + $0x38] sm:$0xff]  }
  0xe7   :  { %v112_v59 = vadd.f32 %v111_v57, %v110_v55  ;;  %v799_v55 = vld [vmem:[%s1071_s3 + $0x78] sm:$0xff]   ;;  %v198_v57 = vsub.s32 3, %v976_v40 }
  0xe8   :  { %v107_v60 = vrot.slane %v106_v58, 1 }
  0xe9   :  { %v113_v61 = vrot.slane %v112_v59, 1 }
  0xea   :  { %v108_v62 = vadd.f32 %v107_v60, %v106_v58  ;;  %v199_v58 = vrot.slane %v982_v42, %v198_v57 }
  0xeb   :  { %v114_v63 = vadd.f32 %v113_v61, %v112_v59  ;;  %v203_v59 = vrot.slane %v987_v43, %v198_v57  ;;  %v501_v57 = vsub.s32 6, %v976_v40 }
  0xec   :  { %v116_v0 = vmul.f32 0.125, %v108_v62 }
  0xed   :  { %v117_v1 = vmul.f32 0.125, %v114_v63 }
  0xee   :  { %v118_v2 = vsub.f32 %v97_v47, %v116_v0  ;;  %v791_v47 = vld [vmem:[%s1071_s3 + $0x58] sm:$0xff]  }
  0xef   :  { %v119_v3 = vsub.f32 %v99_v49, %v117_v1  ;;  %713 = vmatprep.subr.bf16.mxu0 %v791_v47  ;;  %v793_v49 = vld [vmem:[%s1071_s3 + $0x60] sm:$0xff]   ;;  %s834_s3 = smov [#allocation2]  }
  0xf0   :  { %v120_v4 = vmul.f32 %v118_v2, %v118_v2  ;;  %714 = vmatpush3.bf16.msra.mxu0 %v792_v48  ;;  %v458_v48 = vrot.slane %v982_v42, %v457_v39  ;;  %s646_s16 = sshll.u32 %s834_s3, 4  ;;  %s647_s16 = int_to_ptr.vmem [resolvable:$true] %s646_s16 }
  0xf1   :  { %v121_v5 = vmul.f32 %v119_v3, %v119_v3  ;;  %715 = vmatprep.subr.bf16.mxu0 %v793_v49  ;;  %s809_s17 = scalar_lea.vmem %s647_s16, 128  ;;  %p814_p1 = scmp.lt.s32.totalorder %s647_s16, %s647_s16 }
  0xf2   :  { %v122_v6 = vrot.slane %v120_v4, 4  ;;  %p810_p0 = scmp.ne.s32.totalorder %s647_s16, %s809_s17  ;;  %p815_p2 = scmp.lt.s32.totalorder %s809_s17, %s809_s17 }
  0xf3   :  { %v128_v7 = vrot.slane %v121_v5, 4 }
  0xf4   :  { %v123_v8 = vadd.f32 %v122_v6, %v120_v4  ;;  %716 = vmatpush3.bf16.msra.mxu0 %v794_v50  ;;  %v462_v50 = vrot.slane %v987_v43, %v457_v39  ;;  %p816_p3 = por %p815_p2, %p814_p1 }
  0xf5   :  { %v129_v9 = vadd.f32 %v128_v7, %v121_v5  ;;  %717 = vmatprep.subr.bf16.mxu0 %v795_v51 }
  0xf6   :  { %v124_v10 = vrot.slane %v123_v8, 2  ;;  %p817_p4 = pnand %p816_p3, %p810_p0 }
  0xf7   :  { %v130_v11 = vrot.slane %v129_v9, 2 }
  0xf8   :  { %v125_v12 = vadd.f32 %v124_v10, %v123_v8  ;;  %718 = vmatpush3.bf16.msra.mxu0 %v796_v52 }
  0xf9   :  { %v131_v13 = vadd.f32 %v130_v11, %v129_v9  ;;  %719 = vmatprep.subr.bf16.mxu0 %v797_v53 }
  0xfa   :  { %v126_v14 = vrot.slane %v125_v12, 1 }
  0xfb   :  { %v132_v15 = vrot.slane %v131_v13, 1 }
  0xfc   :  { %v127_v16 = vadd.f32 %v126_v14, %v125_v12  ;;  %720 = vmatpush3.bf16.msra.mxu0 %v798_v54 }
  0xfd   :  { %v133_v17 = vadd.f32 %v132_v15, %v131_v13  ;;  %721 = vmatprep.subr.bf16.mxu0 %v799_v55 }
  0xfe   :  { %v134_v18 = vmul.f32 0.125, %v127_v16 }
  0xff   :  { %v135_v19 = vmul.f32 0.125, %v133_v17 }
 0x100   :  { %v136_v20 = vadd.f32 1e-05, %v134_v18  ;;  %722 = vmatpush3.bf16.msra.mxu0 %v800_v56 }
 0x101   :  { %v137_v21 = vadd.f32 1e-05, %v135_v19 }
 0x102   :  { %801 = vrsqrt.f32 %v136_v20 }
 0x103   :  { %803 = vrsqrt.f32 %v137_v21 }
 0x10c   :  { %v802_v25 = vpop.eup %801 }
 0x10d   :  { %v804_v27 = vpop.eup %803  ;;  %v140_v28 = vmul.f32 %v802_v25, %v118_v2 }
 0x10e   :  { %v141_v30 = vmul.f32 %v804_v27, %v119_v3 }
 0x10f   :  { %v150_v32 = vmul.f32 %v145_v24, %v140_v28 }
 0x110   :  { %v151_v33 = vmul.f32 %v149_v26, %v141_v30 }
 0x111   :  { %v160_v34 = vadd.f32 %v155_v29, %v150_v32 }
 0x112   :  { %v161_v35 = vadd.f32 %v159_v31, %v151_v33 }
 0x113   :  { %v162_v37 = vpack.c.bf16 %v160_v34, %v160_v34 }
 0x114   :  { %v163_v36 = vpack.c.bf16 %v161_v35, %v161_v35 }
 0x116   :  { %396 = vmatprep.mubr.bf16.mxu1 %v163_v36 }
 0x117   :  { %397 = vmatmul.mubr.bf16.vlgmr.msra.gmra.mrb[0].mxu1 %v162_v37 }
 0x1ea   :  { %v398_v60 = vpop.f32.mrb[0].mxu1 }
 0x1eb   :  { %v399_v61 = vadd.f32 %v398_v60, %v199_v58  ;;  %v400_v62 = vpop.f32.mrb[1].mxu1 }
 0x1ec   :  { %v401_v63 = vadd.f32 %v400_v62, %v203_v59  ;;  %v402_v0 = vpop.f32.mrb[2].mxu1  ;;  %v502_v59 = vrot.slane %v982_v42, %v501_v57 }
 0x1ed   :  { %v405_v1 = vmax.f32 %v399_v61, 0.0  ;;  %v403_v2 = vpop.f32.mrb[3].mxu1 }
 0x1ee   :  { %v406_v3 = vmax.f32 %v401_v63, 0.0 }
 0x1ef   :  { %v407_v4 = vrot.slane %v405_v1, 4 }
 0x1f0   :  { %v413_v5 = vrot.slane %v406_v3, 4 }
 0x1f1   :  { %v408_v6 = vadd.f32 %v407_v4, %v405_v1 }
 0x1f2   :  { %v414_v7 = vadd.f32 %v413_v5, %v406_v3 }
 0x1f3   :  { %v409_v8 = vrot.slane %v408_v6, 2 }
 0x1f4   :  { %v415_v9 = vrot.slane %v414_v7, 2 }
 0x1f5   :  { %v410_v10 = vadd.f32 %v409_v8, %v408_v6 }
 0x1f6   :  { %v416_v11 = vadd.f32 %v415_v9, %v414_v7 }
 0x1f7   :  { %v411_v12 = vrot.slane %v410_v10, 1 }
 0x1f8   :  { %v417_v13 = vrot.slane %v416_v11, 1 }
 0x1f9   :  { %v412_v14 = vadd.f32 %v411_v12, %v410_v10 }
 0x1fa   :  { %v418_v15 = vadd.f32 %v417_v13, %v416_v11 }
 0x1fb   :  { %v419_v16 = vmul.f32 0.125, %v412_v14 }
 0x1fc   :  { %v420_v17 = vmul.f32 0.125, %v418_v15 }
 0x1fd   :  { %v421_v18 = vsub.f32 %v405_v1, %v419_v16 }
 0x1fe   :  { %v422_v19 = vsub.f32 %v406_v3, %v420_v17 }
 0x1ff   :  { %v423_v20 = vmul.f32 %v421_v18, %v421_v18 }
 0x200   :  { %v424_v21 = vmul.f32 %v422_v19, %v422_v19 }
 0x201   :  { %v425_v22 = vrot.slane %v423_v20, 4 }
 0x202   :  { %v431_v23 = vrot.slane %v424_v21, 4 }
 0x203   :  { %v426_v24 = vadd.f32 %v425_v22, %v423_v20 }
 0x204   :  { %v432_v25 = vadd.f32 %v431_v23, %v424_v21 }
 0x205   :  { %v427_v26 = vrot.slane %v426_v24, 2 }
 0x206   :  { %v433_v27 = vrot.slane %v432_v25, 2 }
 0x207   :  { %v428_v28 = vadd.f32 %v427_v26, %v426_v24 }
 0x208   :  { %v434_v29 = vadd.f32 %v433_v27, %v432_v25 }
 0x209   :  { %v429_v30 = vrot.slane %v428_v28, 1 }
 0x20a   :  { %v435_v31 = vrot.slane %v434_v29, 1 }
 0x20b   :  { %v430_v32 = vadd.f32 %v429_v30, %v428_v28 }
 0x20c   :  { %v436_v33 = vadd.f32 %v435_v31, %v434_v29 }
 0x20d   :  { %v437_v34 = vmul.f32 0.125, %v430_v32 }
 0x20e   :  { %v438_v35 = vmul.f32 0.125, %v436_v33 }
 0x20f   :  { %v439_v36 = vadd.f32 1e-05, %v437_v34 }
 0x210   :  { %v440_v37 = vadd.f32 1e-05, %v438_v35 }
 0x211   :  { %805 = vrsqrt.f32 %v439_v36 }
 0x212   :  { %807 = vrsqrt.f32 %v440_v37 }
 0x21b   :  { %v806_v44 = vpop.eup %805 }
 0x21c   :  { %v808_v46 = vpop.eup %807  ;;  %v443_v47 = vmul.f32 %v806_v44, %v421_v18 }
 0x21d   :  { %v444_v49 = vmul.f32 %v808_v46, %v422_v19 }
 0x21e   :  { %v453_v51 = vmul.f32 %v448_v41, %v443_v47 }
 0x21f   :  { %v454_v52 = vmul.f32 %v452_v45, %v444_v49 }
 0x220   :  { %v463_v53 = vadd.f32 %v458_v48, %v453_v51 }
 0x221   :  { %v464_v54 = vadd.f32 %v462_v50, %v454_v52 }
 0x222   :  { %v465_v56 = vpack.c.bf16 %v463_v53, %v463_v53 }
 0x223   :  { %v466_v55 = vpack.c.bf16 %v464_v54, %v464_v54 }
 0x225   :  { %631 = vmatprep.mubr.bf16.mxu0 %v466_v55 }
 0x226   :  { %632 = vmatmul.mubr.bf16.vlgmr.msra.gmra.mrb[4].mxu0 %v465_v56 }
 0x2f9   :  { %v723_v58 = vpop.f32.mrb[4].mxu0 }
 0x2fa   :  { %v724_v60 = vpop.f32.mrb[5].mxu0 }
 0x2fb   :  { %v725_v61 = vadd.f32 %v724_v60, %v723_v58  ;;  %v726_v62 = vpop.f32.mrb[6].mxu0 }
 0x2fc   :  { %v727_v63 = vpop.f32.mrb[7].mxu0 }
 0x2fd   :  { %v634_v43 = vadd.f32 %v725_v61, %v502_v59 }
 0x2ff   :  { %639 = vst [vmem:[#allocation2] sm:$0xff] %v634_v43 }
 0x300   :  { %820 = shalt.err (!%p817_p4)
}
 0x301   :  { %s821_s20 = scalar_lea.hbm %s1073_s5, 128 }
 0x302   :  { %p822_p5 = scmp.ne.s32.totalorder %s1073_s5, %s821_s20  ;;  %p825_p6 = scmp.lt.u32.totalorder %s821_s20, %s1073_s5 }
 0x304   :  { %p827_p7 = pnand %p825_p6, %p822_p5 }
 0x306   :  { %830 = shalt.err (!%p827_p7)
}
 0x307   :  { %649 = dma.vmem_to_hbm [thread:$0]  %s647_s16, 128, %s1073_s5, [#allocation3]  }
 0x308   :  { %831 = dma.done.wait [#allocation3], 128  }
 0x309   :  { %832 = vsyncadd [#allocation3], 4294967168 }
 0x30a   :  { %653 = vsyncpa [#allocation3], 1 }

</bundles_post_ra>
